<compile_context>
chip_gen: v7x
topology: tpu7x:2x2x1
jax: 0.10.0
libtpu: 0.0.40
codegen_flags: <defaults>
</compile_context>

<pallas_src>
import functools

import jax
import jax.numpy as jnp
from jax.experimental import pallas as pl
from jax.experimental import pallas as _pl_unused  # noqa: F401 (keep import surface minimal)
from jax.experimental.pallas import tpu as pltpu

LANE = 128  # hidden / output / input feature dims are padded to this lane width


def _fc_bn_kernel(x_ref, w_ref, bias_ref, out_ref):
    """BN(train stats) -> (Linear, ReLU) x2 -> Linear for one (B, 128) batch."""
    x = x_ref[0].astype(jnp.float32)                          # (B, 128)
    inv_b = 1.0 / x.shape[0]
    eps = 1e-5

    # ---- BatchNorm1d statistics, single pass (biased variance, clamped) ----
    s = jnp.sum(x, axis=0, keepdims=True)                     # (1, 128)
    ss = jnp.sum(x * x, axis=0, keepdims=True)                 # (1, 128)
    mean = s * inv_b
    var = jnp.maximum(ss * inv_b - mean * mean, 0.0)           # clamp cancellation
    inv_std = jax.lax.rsqrt(var + eps)
    # gamma/beta are folded into w1/b1, so only normalize here.
    x_hat = ((x - mean) * inv_std).astype(jnp.bfloat16)

    w = w_ref[...]                                             # (128, 384) bf16
    bias = bias_ref[...]                                       # (3, 128) f32

    # ---- fc1 + ReLU (gamma/beta folded in) ----
    h = jnp.dot(x_hat, w[:, 0:LANE], preferred_element_type=jnp.float32)
    h = jnp.maximum(h + bias[0:1, :], 0.0)                     # (B, 128)

    # ---- fc2 + ReLU ----
    h = jnp.dot(h.astype(jnp.bfloat16), w[:, LANE:2 * LANE],
                preferred_element_type=jnp.float32)
    h = jnp.maximum(h + bias[1:2, :], 0.0)                     # (B, 128)

    # ---- fc3 (output layer, no activation); lane-dense 128-wide store ----
    out = jnp.dot(h.astype(jnp.bfloat16), w[:, 2 * LANE:3 * LANE],
                  preferred_element_type=jnp.float32) + bias[2:3, :]
    out_ref[0] = out.astype(out_ref.dtype)


def _pad_to(arr, shape):
    return jnp.pad(arr, [(0, t - s) for s, t in zip(arr.shape, shape)])


def prepare_params(gamma, beta, w1, b1, w2, b2, w3, b3):
    """Fold BN affine into fc1, pad to 128 lanes, pack weights into one slab.

    Run once; the returned arrays are what the kernel consumes.
    Weight layout is (in_dim, out_dim), i.e. transposed vs. torch.nn.Linear.
    Returns:
      w_packed: (128, 384) bf16  -- [w1 | w2 | w3], zero rows beyond real dims.
      bias:     (3, 128)   f32   -- [b1_folded; b2; b3], zero beyond real dims.
    """
    w1f = gamma[:, None] * w1                                  # (P, H1)
    b1f = b1 + beta @ w1                                       # (H1,)

    w1p = _pad_to(w1f, (LANE, LANE))
    w2p = _pad_to(w2, (LANE, LANE))
    w3p = _pad_to(w3, (LANE, LANE))
    w_packed = jnp.concatenate([w1p, w2p, w3p], axis=1).astype(jnp.bfloat16)

    bias = jnp.stack([_pad_to(b1f, (LANE,)),
                      _pad_to(b2, (LANE,)),
                      _pad_to(b3, (LANE,))]).astype(jnp.float32)
    return w_packed, bias


@functools.partial(jax.jit, static_argnames=("act_dim",))
def fc_network_with_batchnorm_rollout(xs, w_packed, bias, *, act_dim):
    """Batched forward over T independent (B, P) batches (e.g. RL rollout).

    xs: (T, B, P) float32.  Returns (T, B, act_dim) float32.
    Weights stay VMEM-resident across the T grid steps (constant index_map).
    """
    T, B, P = xs.shape
    xs_p = jnp.pad(xs, ((0, 0), (0, 0), (0, LANE - P)))        # (T, B, 128)

    cost = pl.CostEstimate(
        flops=int(T * (2 * B * LANE * LANE * 3)),
        transcendentals=int(T * LANE),
        bytes_accessed=int(xs_p.size * 4 + w_packed.size * 2
                           + bias.size * 4 + T * B * LANE * 4),
    )

    out_padded = pl.pallas_call(
        _fc_bn_kernel,
        out_shape=jax.ShapeDtypeStruct((T, B, LANE), jnp.float32),
        grid=(T,),
        in_specs=[
            pl.BlockSpec((1, B, LANE), lambda t: (t, 0, 0)),    # per-step input
            pl.BlockSpec((LANE, 3 * LANE), lambda t: (0, 0)),   # resident weights
            pl.BlockSpec((3, LANE), lambda t: (0, 0)),          # resident biases
        ],
        out_specs=pl.BlockSpec((1, B, LANE), lambda t: (t, 0, 0)),
        compiler_params=pltpu.CompilerParams(
            dimension_semantics=("parallel",)),
        cost_estimate=cost,
    )(xs_p, w_packed, bias)
    return out_padded[:, :, :act_dim]


def fc_network_with_batchnorm(x, w_packed, bias, *, act_dim):
    """Single forward: x is (B, P), returns (B, act_dim)."""
    return fc_network_with_batchnorm_rollout(
        x[None], w_packed, bias, act_dim=act_dim)[0]


def _init_linear(key, in_dim, out_dim):
    """PyTorch nn.Linear default init: U(-1/sqrt(in), 1/sqrt(in))."""
    kw, kb = jax.random.split(key)
    bound = 1.0 / jnp.sqrt(jnp.float32(in_dim))
    w = jax.random.uniform(kw, (in_dim, out_dim), jnp.float32, -bound, bound)
    b = jax.random.uniform(kb, (out_dim,), jnp.float32, -bound, bound)
    return w, b


if __name__ == "__main__":
    # Module config: obs_dim=32, act_dim=8, hidden_sizes=(64, 64), relu, dropout=0
    T, B, OBS, H1, H2, ACT = 4, 8, 32, 64, 64, 8

    key = jax.random.PRNGKey(0)
    kx, k1, k2, k3 = jax.random.split(key, 4)

    xs = jax.random.normal(kx, (T, B, OBS), jnp.float32)       # T independent batches

    # BatchNorm1d affine params (default init: gamma=1, beta=0).
    gamma = jnp.ones((OBS,), jnp.float32)
    beta = jnp.zeros((OBS,), jnp.float32)

    w1, b1 = _init_linear(k1, OBS, H1)
    w2, b2 = _init_linear(k2, H1, H2)
    w3, b3 = _init_linear(k3, H2, ACT)

    w_packed, bias = prepare_params(gamma, beta, w1, b1, w2, b2, w3, b3)

    # Rollout-style call (weights VMEM-resident across the T grid steps).
    out = fc_network_with_batchnorm_rollout(xs, w_packed, bias, act_dim=ACT)
    out = jax.block_until_ready(out)
    assert out.shape == (T, B, ACT)

    # Single-batch call reuses the same kernel with T=1.
    out_single = fc_network_with_batchnorm(xs[0], w_packed, bias, act_dim=ACT)
    out_single = jax.block_until_ready(out_single)
    assert out_single.shape == (B, ACT)
    assert jnp.allclose(out_single, out[0], atol=1e-6, rtol=1e-6)

    # Reference 1: identical math to the kernel (bf16 matmul operands, f32 acc).
    w1p = w_packed[:, 0:LANE]
    w2p = w_packed[:, LANE:2 * LANE]
    w3p = w_packed[:, 2 * LANE:3 * LANE]

    def ref_same_math(x):                                      # x: (B, OBS)
        xp = jnp.pad(x, ((0, 0), (0, LANE - OBS)))
        m = xp.mean(0, keepdims=True)
        v = jnp.maximum((xp * xp).mean(0, keepdims=True) - m * m, 0.0)
        xh = ((xp - m) * jax.lax.rsqrt(v + 1e-5)).astype(jnp.bfloat16)
        h = jnp.maximum(
            jnp.dot(xh, w1p, preferred_element_type=jnp.float32) + bias[0:1], 0.0)
        h = jnp.maximum(
            jnp.dot(h.astype(jnp.bfloat16), w2p,
                    preferred_element_type=jnp.float32) + bias[1:2], 0.0)
        o = jnp.dot(h.astype(jnp.bfloat16), w3p,
                    preferred_element_type=jnp.float32) + bias[2:3]
        return o[:, :ACT]

    # Reference 2: full-f32 PyTorch-equivalent math (looser tol, bf16 weights).
    def ref_f32(x):
        m = x.mean(0, keepdims=True)
        v = ((x - m) ** 2).mean(0, keepdims=True)
        h = (x - m) / jnp.sqrt(v + 1e-5) * gamma + beta
        h = jnp.maximum(h @ w1 + b1, 0.0)
        h = jnp.maximum(h @ w2 + b2, 0.0)
        return h @ w3 + b3

    ref1 = jnp.stack([ref_same_math(xs[t]) for t in range(T)])
    ref2 = jnp.stack([ref_f32(xs[t]) for t in range(T)])

    assert jnp.allclose(out, ref1, atol=1e-4, rtol=1e-4)
    assert jnp.allclose(out, ref2, atol=5e-2, rtol=5e-2)

    print("KERNEL_OK")
</pallas_src>

<mosaic_0001>
module attributes {stable_mosaic.version = 11 : i64} {
  func.func @_fc_bn_kernel(%arg0: i32, %arg1: memref<1x8x128xf32, #tpu.memory_space<vmem>>, %arg2: memref<128x384xbf16, #tpu.memory_space<vmem>>, %arg3: memref<3x128xf32, #tpu.memory_space<vmem>>, %arg4: memref<1x8x128xf32, #tpu.memory_space<vmem>>) attributes {dimension_semantics = [#tpu.dimension_semantics<parallel>], iteration_bounds = array<i64: 4>, scalar_prefetch = 0 : i64, scratch_operands = 0 : i64, tpu.core_type = #tpu.core_type<tc>, window_params = [{transform_indices = @transform_0, window_bounds = array<i64: 1, 8, 128>}, {pipeline_mode = #tpu.pipeline_mode<synchronous>, transform_indices = @transform_1, window_bounds = array<i64: 128, 384>}, {pipeline_mode = #tpu.pipeline_mode<synchronous>, transform_indices = @transform_2, window_bounds = array<i64: 3, 128>}, {transform_indices = @transform_3, window_bounds = array<i64: 1, 8, 128>}]} {
    %c0 = arith.constant 0 : index
    %c0_0 = arith.constant 0 : index
    %c0_1 = arith.constant 0 : index
    %0 = vector.load %arg1[%c0, %c0_0, %c0_1] : memref<1x8x128xf32, #tpu.memory_space<vmem>>, vector<1x8x128xf32>
    %1 = vector.shape_cast %0 : vector<1x8x128xf32> to vector<8x128xf32>
    %cst = arith.constant dense<0.000000e+00> : vector<128xf32>
    %2 = vector.multi_reduction <add>, %1, %cst [0] : vector<8x128xf32> to vector<128xf32>
    %3 = vector.shape_cast %2 : vector<128xf32> to vector<1x128xf32>
    %4 = arith.mulf %1, %1 : vector<8x128xf32>
    %cst_2 = arith.constant dense<0.000000e+00> : vector<128xf32>
    %5 = vector.multi_reduction <add>, %4, %cst_2 [0] : vector<8x128xf32> to vector<128xf32>
    %6 = vector.shape_cast %5 : vector<128xf32> to vector<1x128xf32>
    %cst_3 = arith.constant 1.250000e-01 : f32
    %7 = vector.broadcast %cst_3 : f32 to vector<1x128xf32>
    %8 = arith.mulf %3, %7 : vector<1x128xf32>
    %cst_4 = arith.constant 1.250000e-01 : f32
    %9 = vector.broadcast %cst_4 : f32 to vector<1x128xf32>
    %10 = arith.mulf %6, %9 : vector<1x128xf32>
    %11 = arith.mulf %8, %8 : vector<1x128xf32>
    %12 = arith.subf %10, %11 : vector<1x128xf32>
    %cst_5 = arith.constant 0.000000e+00 : f32
    %13 = vector.broadcast %cst_5 : f32 to vector<1x128xf32>
    %14 = arith.maximumf %12, %13 : vector<1x128xf32>
    %cst_6 = arith.constant 9.99999974E-6 : f32
    %15 = vector.broadcast %cst_6 : f32 to vector<1x128xf32>
    %16 = arith.addf %14, %15 : vector<1x128xf32>
    %17 = math.rsqrt %16 : vector<1x128xf32>
    %18 = vector.broadcast %8 : vector<1x128xf32> to vector<8x128xf32>
    %19 = arith.subf %1, %18 : vector<8x128xf32>
    %20 = vector.broadcast %17 : vector<1x128xf32> to vector<8x128xf32>
    %21 = arith.mulf %19, %20 : vector<8x128xf32>
    %22 = arith.truncf %21 : vector<8x128xf32> to vector<8x128xbf16>
    %c0_7 = arith.constant 0 : index
    %c0_8 = arith.constant 0 : index
    %23 = vector.load %arg2[%c0_7, %c0_8] : memref<128x384xbf16, #tpu.memory_space<vmem>>, vector<128x384xbf16>
    %c0_9 = arith.constant 0 : index
    %c0_10 = arith.constant 0 : index
    %24 = vector.load %arg3[%c0_9, %c0_10] : memref<3x128xf32, #tpu.memory_space<vmem>>, vector<3x128xf32>
    %25 = vector.extract_strided_slice %23 {offsets = [0, 0], sizes = [128, 128], strides = [1, 1]} : vector<128x384xbf16> to vector<128x128xbf16>
    %cst_11 = arith.constant dense<0.000000e+00> : vector<8x128xf32>
    %26 = tpu.matmul %22, %25, %cst_11 {dimension_numbers = #tpu.dot_dimension_numbers<[1], [0], [0], [1], [0, 0, 1, 1], [], []>} : vector<8x128xbf16>, vector<128x128xbf16>, vector<8x128xf32> -> vector<8x128xf32>
    %27 = vector.extract_strided_slice %24 {offsets = [0, 0], sizes = [1, 128], strides = [1, 1]} : vector<3x128xf32> to vector<1x128xf32>
    %28 = vector.broadcast %27 : vector<1x128xf32> to vector<8x128xf32>
    %29 = arith.addf %26, %28 : vector<8x128xf32>
    %cst_12 = arith.constant 0.000000e+00 : f32
    %30 = vector.broadcast %cst_12 : f32 to vector<8x128xf32>
    %31 = arith.maximumf %29, %30 : vector<8x128xf32>
    %32 = arith.truncf %31 : vector<8x128xf32> to vector<8x128xbf16>
    %33 = vector.extract_strided_slice %23 {offsets = [0, 128], sizes = [128, 128], strides = [1, 1]} : vector<128x384xbf16> to vector<128x128xbf16>
    %cst_13 = arith.constant dense<0.000000e+00> : vector<8x128xf32>
    %34 = tpu.matmul %32, %33, %cst_13 {dimension_numbers = #tpu.dot_dimension_numbers<[1], [0], [0], [1], [0, 0, 1, 1], [], []>} : vector<8x128xbf16>, vector<128x128xbf16>, vector<8x128xf32> -> vector<8x128xf32>
    %35 = vector.extract_strided_slice %24 {offsets = [1, 0], sizes = [1, 128], strides = [1, 1]} : vector<3x128xf32> to vector<1x128xf32>
    %36 = vector.broadcast %35 : vector<1x128xf32> to vector<8x128xf32>
    %37 = arith.addf %34, %36 : vector<8x128xf32>
    %cst_14 = arith.constant 0.000000e+00 : f32
    %38 = vector.broadcast %cst_14 : f32 to vector<8x128xf32>
    %39 = arith.maximumf %37, %38 : vector<8x128xf32>
    %40 = arith.truncf %39 : vector<8x128xf32> to vector<8x128xbf16>
    %41 = vector.extract_strided_slice %23 {offsets = [0, 256], sizes = [128, 128], strides = [1, 1]} : vector<128x384xbf16> to vector<128x128xbf16>
    %cst_15 = arith.constant dense<0.000000e+00> : vector<8x128xf32>
    %42 = tpu.matmul %40, %41, %cst_15 {dimension_numbers = #tpu.dot_dimension_numbers<[1], [0], [0], [1], [0, 0, 1, 1], [], []>} : vector<8x128xbf16>, vector<128x128xbf16>, vector<8x128xf32> -> vector<8x128xf32>
    %43 = vector.extract_strided_slice %24 {offsets = [2, 0], sizes = [1, 128], strides = [1, 1]} : vector<3x128xf32> to vector<1x128xf32>
    %44 = vector.broadcast %43 : vector<1x128xf32> to vector<8x128xf32>
    %45 = arith.addf %42, %44 : vector<8x128xf32>
    %c0_16 = arith.constant 0 : index
    %c0_17 = arith.constant 0 : index
    %c0_18 = arith.constant 0 : index
    %46 = vector.load %arg4[%c0_16, %c0_17, %c0_18] : memref<1x8x128xf32, #tpu.memory_space<vmem>>, vector<1x8x128xf32>
    %47 = vector.shape_cast %46 : vector<1x8x128xf32> to vector<8x128xf32>
    %48 = vector.shape_cast %45 : vector<8x128xf32> to vector<1x8x128xf32>
    tpu.vector_store %arg4[%c0_16, %c0_17, %c0_18], %48 {strides = array<i32>} : memref<1x8x128xf32, #tpu.memory_space<vmem>>, vector<1x8x128xf32>,
    return
  }
  func.func @transform_0(%arg0: i32) -> (i32, i32, i32) {
    %c0_i32 = arith.constant 0 : i32
    %c0_i32_0 = arith.constant 0 : i32
    %c0_i32_1 = arith.constant 0 : i32
    return %arg0, %c0_i32, %c0_i32_0 : i32, i32, i32
  }
  func.func @transform_1(%arg0: i32) -> (i32, i32) {
    %c0_i32 = arith.constant 0 : i32
    %c0_i32_0 = arith.constant 0 : i32
    %c0_i32_1 = arith.constant 0 : i32
    return %c0_i32, %c0_i32_0 : i32, i32
  }
  func.func @transform_2(%arg0: i32) -> (i32, i32) {
    %c0_i32 = arith.constant 0 : i32
    %c0_i32_0 = arith.constant 0 : i32
    %c0_i32_1 = arith.constant 0 : i32
    return %c0_i32, %c0_i32_0 : i32, i32
  }
  func.func @transform_3(%arg0: i32) -> (i32, i32, i32) {
    %c0_i32 = arith.constant 0 : i32
    %c0_i32_0 = arith.constant 0 : i32
    %c0_i32_1 = arith.constant 0 : i32
    return %arg0, %c0_i32, %c0_i32_0 : i32, i32, i32
  }
}

</mosaic_0001>

<bundles_post_ra>
// kernel: fc_network_with_batchnorm_rollout.1
= control target key start
LH: loop header
LB: loop body
LE: loop exit
PB: predicated region body
PF: predicated region fallthrough
CT: control target
= control target key end

     0   :  { %8 = vsyncpa [#allocation3], 0  ;;  %s1090_s0 = inlined_call_operand.vmem [shape: f32[4,8,128], index: 0, kind: input, shape index: {}]   ;;  %s1091_s1 = inlined_call_operand.hbm [shape: bf16[128,384], index: 1, kind: input, shape index: {}]   ;;  %s1092_s2 = inlined_call_operand.vmem [shape: f32[3,128], index: 2, kind: input, shape index: {}]   ;;  %s1093_s3 = inlined_call_operand.hbm [shape: f32[4,8,128], index: 3, kind: output, shape index: {}]  }
   0x1   :  { %9 = vsyncpa [#allocation4], 0 }
   0x2   :  { %11 = vsyncpa [#allocation4 + $0x1], 0  ;;  %s922_s12 = smov 0   ;;  %s924_s13 = smov 0  }
   0x3   :  { %s926_s14 = smov 0   ;;  %s928_s15 = smov 0  }
   0x4 LB: > { %s943_s16 = sadd.s32 4294967295, %s894_s15   ;;  %s589_s17 = sadd.s32 4294967294, %s894_s15   ;;  %s894_s15 = sphi %s928_s15, %s1109_s15   ;;  %s890_s14 = sphi %s926_s14, %s1108_s14   ;;  %s886_s13 = sphi %s924_s13, %s1107_s13   ;;  %s882_s12 = sphi %s922_s12, %s1106_s12  }
   0x5   : > { %s947_s18 = sadd.s32 1, %s894_s15   ;;  %s92_s19 = sadd.s32 1, %s890_s14 }
   0x6   : > { %s89_s20 = ssub.s32 %s894_s15, %s947_s18  ;;  %p102_p0 = scmp.ne.s32.totalorder %s890_s14, %s886_s13 }
   0x7   : > { %p90_p1 = scmp.eq.s32.totalorder %s89_s20, 0  ;;  %p103_p2 = scmp.eq.s32.totalorder %s943_s16, 3 }
   0x8   : > { %p108_p3 = scmp.ne.s32.totalorder %s886_s13, %s882_s12  ;;  %p109_p4 = scmp.eq.s32.totalorder %s589_s17, 3 }
   0x9   : > { %s958_s21 = scalar_select %p90_p1, %s890_s14, %s92_s19  }
   0xa   : > { %p960_p5 = por %p103_p2, %p102_p0  ;;  %p964_p6 = por %p109_p4, %p108_p3 }
   0xb   : > { %p590_p7 = scmp.ge.s32.totalorder %s894_s15, 1  ;;  %p116_p8 = scmp.lt.s32.totalorder %s894_s15, 5 }
   0xc   : > { %s1097_s22 = scalar_select %p960_p5, 1, 0 }
   0xd   : > { %s1098_s23 = scalar_select %p964_p6, 1, 0 }
   0xe   : > { %p1094_p9 = scmp.eq.s32.totalorder %s943_s16, 0  ;;  %p971_p10 = pnand %p590_p7, %p116_p8 }
   0xf   : > { %s896_s25 = smov [#allocation2]   ;;  %s800_s30 = scalar_lea.hbm %s1091_s1, 3072 }
  0x10   : > { %s1099_s24 = scalar_select %p971_p10, 1, 0 }
  0x11   : > { %s128_s26 = sshll.u32 %s896_s25, 4  ;;  %p718_p11 = pneg %p971_p10  ;;  %s129_s26 = int_to_ptr.vmem [resolvable:$true] %s128_s26 }
  0x12   : > { %p801_p13 = scmp.ne.s32.totalorder %s1091_s1, %s800_s30  ;;  %p807_p3 = scmp.lt.u32.totalorder %s800_s30, %s1091_s1 }
  0x13   : > { %p979_p12 = pnand %p1094_p9, %p718_p11 }
  0x15   : > { %p802_p0 = pneg %p979_p12 }
  0x17   : > { %p803_p1 = pnand %p802_p0, %p801_p13 }
  0x19   : > { %p804_p2 = pneg %p803_p1 }
  0x1b   : > { %p809_p4 = pnand %p807_p3, %p804_p2 }
  0x1d   : > { %812 = shalt.err (!%p809_p4)
}
  0x1e   : > { %s813_s8 = scalar_lea.vmem %s129_s26, 3072  ;;  %p821_p9 = scmp.lt.s32.totalorder %s129_s26, %s129_s26 }
  0x1f   : > { %p814_p7 = scmp.ne.s32.totalorder %s129_s26, %s813_s8  ;;  %p822_p6 = scmp.lt.s32.totalorder %s813_s8, %s813_s8 }
  0x21   : > { %p816_p8 = pnand %p814_p7, %p802_p0  ;;  %p823_p5 = por %p822_p6, %p821_p9 }
  0x23   : > { %p817_p11 = pneg %p816_p8 }
  0x25   : > { %p824_p10 = pnand %p823_p5, %p817_p11 }
  0x27   : > { %827 = shalt.err (!%p824_p10)
}
  0x28   : > { %s897_s9 = smov 192   ;;  %s898_s10 = smov 12  }
  0x29   : > { %721 = dma.hbm_to_vmem [thread:$0]  (!%p979_p12), %s1091_s1, 3072, %s129_s26, [#allocation3], %s897_s9, %s897_s9, %s898_s10  }
  0x2a   : > { %p1101_p13 = scmp.ne.s32.totalorder %s1099_s24, 0 }
  0x2b   : > { %p1102_p1 = scmp.eq.s32.totalorder (!%p1101_p13), %s943_s16, 0 }
  0x2c   : > { %154 = sbr.rel (%p1101_p13) target bundleno = 760 (0x2f8), region = 32 }
  0x33   : > { %873 = dma.done.wait (%p1102_p1), [#allocation3], 3072   ;;  %p1103_p0 = pmov %p1102_p1 }
  0x34   : > { %v899_v0 = vmov 0.0   ;;  %vm900_vm0 = vmmov 0   ;;  %p177_p5 = scmp.lt.s32.totalorder %s943_s16, 3  ;;  %v766_v1 = vld [vmem:[#allocation2] ss:$12 sps:$4 sm:$0xff]   ;;  %v239_v47 = vlaneseq  ;;  %s174_s29 = sand.u32 1, %s886_s13  }
  0x35   : > { %875 = vsyncadd (%p1103_p0), [#allocation3], 4294964224  ;;  %652 = vmatprep.subr.bf16.mxu0 %v899_v0  ;;  %668 = vmatprep.mubr.msk.bf16.mxu0 %vm900_vm0, %v899_v0  ;;  %v768_v2 = vld [vmem:[#allocation2 + $0x18] ss:$12 sps:$4 sm:$0xff]   ;;  %v770_v3 = vld [vmem:[#allocation2 + $0x30] ss:$12 sps:$4 sm:$0xff]  }
  0x36   : > { %672 = vmatprep.subr.bf16.mxu1 %v899_v0  ;;  %688 = vmatprep.mubr.msk.bf16.mxu1 %vm900_vm0, %v899_v0  ;;  %s178_s19 = scalar_select %p177_p5, %s943_s16, 3  ;;  %v782_v5 = vld [vmem:[#allocation2 + $0x4] ss:$12 sps:$4 sm:$0xff]   ;;  %v772_v8 = vld [vmem:[#allocation2 + $0x48] ss:$12 sps:$4 sm:$0xff]   ;;  %v240_v48 = vshrl.u32 %v239_v47, 7 }
  0x37   : > { %653 = vmatpush3.bf16.msra.mxu0 %v766_v1  ;;  %673 = vmatpush3.bf16.msra.mxu1 %v782_v5  ;;  %v783_v9 = vld [vmem:[#allocation2 + $0x1c] ss:$12 sps:$4 sm:$0xff]   ;;  %v774_v12 = vld [vmem:[#allocation2 + $0x60] ss:$12 sps:$4 sm:$0xff]   ;;  %v776_v20 = vld [vmem:[#allocation2 + $0x78] ss:$12 sps:$4 sm:$0xff]  }
  0x38   : > { %s596_s20 = sshll.u32 %s178_s19, 3  ;;  %654 = vmatprep.subr.bf16.mxu0 %v899_v0  ;;  %674 = vmatprep.subr.bf16.mxu1 %v899_v0  ;;  %v784_v13 = vld [vmem:[#allocation2 + $0x34] ss:$12 sps:$4 sm:$0xff]   ;;  %v785_v21 = vld [vmem:[#allocation2 + $0x4c] ss:$12 sps:$4 sm:$0xff]   ;;  %v241_v49 = vsub.s32 0, %v240_v48 }
  0x39   : > { %s180_s26 = scalar_lea.vmem %s1090_s0, %s596_s20  ;;  %v778_v26 = vld [vmem:[#allocation2 + $0x90] ss:$12 sps:$4 sm:$0xff]   ;;  %v780_v31 = vld [vmem:[#allocation2 + $0xa8] ss:$12 sps:$4 sm:$0xff]   ;;  %v789_v40 = vld [vmem:[#allocation2 + $0xac] ss:$12 sps:$4 sm:$0xff]  }
  0x3a   : > { %v182_v4 = vld [vmem:[%s180_s26] sm:$0xff]  ;;  %v787_v32 = vld [vmem:[#allocation2 + $0x7c] ss:$12 sps:$4 sm:$0xff]   ;;  %v335_v61 = vsub.s32 1, %v240_v48  ;;  %s595_s30 = sshll.u32 %s174_s29, 3  ;;  %s622_s4 = sshll.u32 %s943_s16, 7 }
  0x3b   : > { %655 = vmatpush3.bf16.msra.mxu0 %v768_v2  ;;  %v183_v6 = vrot.slane %v182_v4, 4  ;;  %v189_v7 = vmul.f32 %v182_v4, %v182_v4  ;;  %675 = vmatpush3.bf16.msra.mxu1 %v783_v9  ;;  %v786_v27 = vld [vmem:[#allocation2 + $0x64] ss:$12 sps:$4 sm:$0xff]   ;;  %v788_v39 = vld [vmem:[#allocation2 + $0x94] ss:$12 sps:$4 sm:$0xff]   ;;  %s176_s5 = scalar_lea.vmem [#allocation5], %s595_s30  ;;  %s1048_s9 = scalar_lea.hbm %s1093_s3, %s622_s4 }
  0x3c   : > { %656 = vmatprep.subr.bf16.mxu0 %v899_v0  ;;  %676 = vmatprep.subr.bf16.mxu1 %v899_v0  ;;  %v790_v41 = vld [vmem:[#allocation2 + $0x8] ss:$12 sps:$4 sm:$0xff]   ;;  %v791_v42 = vld [vmem:[#allocation2 + $0x20] ss:$12 sps:$4 sm:$0xff]   ;;  %v792_v43 = vld [vmem:[#allocation2 + $0x38] ss:$12 sps:$4 sm:$0xff]  }
  0x3d   : > { %v184_v10 = vadd.f32 %v183_v6, %v182_v4  ;;  %v190_v11 = vrot.slane %v189_v7, 4  ;;  %v793_v44 = vld [vmem:[#allocation2 + $0x50] ss:$12 sps:$4 sm:$0xff]   ;;  %v794_v45 = vld [vmem:[#allocation2 + $0x68] ss:$12 sps:$4 sm:$0xff]   ;;  %s518_s6 = sshll.u32 %s176_s5, 4  ;;  %s1050_s6 = int_to_ptr.vmem [resolvable:$true] %s518_s6 }
  0x3e   : > { %v795_v46 = vld [vmem:[#allocation2 + $0x80] ss:$12 sps:$4 sm:$0xff]   ;;  %v796_v59 = vld [vmem:[#allocation2 + $0x98] ss:$12 sps:$4 sm:$0xff]   ;;  %v797_v60 = vld [vmem:[#allocation2 + $0xb0] ss:$12 sps:$4 sm:$0xff]  }
  0x3f   : > { %657 = vmatpush3.bf16.msra.mxu0 %v770_v3  ;;  %v185_v14 = vrot.slane %v184_v10, 2  ;;  %v191_v15 = vadd.f32 %v190_v11, %v189_v7  ;;  %677 = vmatpush3.bf16.msra.mxu1 %v784_v13  ;;  %v238_v50 = vld [vmem:[%s1092_s2] sm:$0x7]  ;;  %v413_v7 = vsub.s32 2, %v240_v48  ;;  %s505_s10 = scalar_lea.sflag [#allocation4], %s174_s29  ;;  %s828_s16 = scalar_lea.vmem %s1050_s6, 128 }
  0x40   : > { %658 = vmatprep.subr.bf16.mxu0 %v899_v0  ;;  %678 = vmatprep.subr.bf16.mxu1 %v899_v0  ;;  %v242_v51 = vrot.slane %v238_v50, %v241_v49  ;;  %v336_v62 = vrot.slane %v238_v50, %v335_v61  ;;  %p829_p6 = scmp.ne.s32.totalorder %s1050_s6, %s828_s16  ;;  %p1104_p9 = scmp.ne.s32.totalorder %s1097_s22, 0 }
  0x41   : > { %v186_v16 = vadd.f32 %v185_v14, %v184_v10  ;;  %v192_v17 = vrot.slane %v191_v15, 2  ;;  %s901_s11 = smov [#allocation5]  }
  0x42   : > { %p830_p10 = pnand %p829_p6, %p1104_p9  ;;  %s832_s17 = sshll.u32 %s901_s11, 4  ;;  %s833_s17 = int_to_ptr.vmem [resolvable:$false] %s832_s17 }
  0x43   : > { %659 = vmatpush3.bf16.msra.mxu0 %v772_v8  ;;  %v187_v18 = vrot.slane %v186_v16, 1  ;;  %v193_v19 = vadd.f32 %v192_v17, %v191_v15  ;;  %679 = vmatpush3.bf16.msra.mxu1 %v785_v21  ;;  %v414_v8 = vrot.slane %v238_v50, %v413_v7  ;;  %s834_s19 = scalar_lea.vmem %s833_s17, 256  ;;  %p835_p2 = scmp.lt.s32.totalorder %s1050_s6, %s833_s17 }
  0x44   : > { %660 = vmatprep.subr.bf16.mxu0 %v899_v0  ;;  %680 = vmatprep.subr.bf16.mxu1 %v899_v0  ;;  %p831_p12 = pneg %p830_p10  ;;  %p836_p3 = scmp.lt.s32.totalorder %s834_s19, %s828_s16 }
  0x45   : > { %v188_v22 = vadd.f32 %v187_v18, %v186_v16  ;;  %v194_v23 = vrot.slane %v193_v19, 1 }
  0x46   : > { %p837_p4 = por %p836_p3, %p835_p2 }
  0x47   : > { %661 = vmatpush3.bf16.msra.mxu0 %v774_v12  ;;  %v195_v24 = vadd.f32 %v194_v23, %v193_v19  ;;  %v196_v25 = vmul.f32 0.125, %v188_v22  ;;  %681 = vmatpush3.bf16.msra.mxu1 %v786_v27 }
  0x48   : > { %662 = vmatprep.subr.bf16.mxu0 %v899_v0  ;;  %682 = vmatprep.subr.bf16.mxu1 %v899_v0  ;;  %p838_p7 = pnand %p837_p4, %p831_p12 }
  0x49   : > { %v197_v28 = vmul.f32 0.125, %v195_v24  ;;  %v198_v29 = vmul.f32 %v196_v25, %v196_v25  ;;  %v203_v35 = vsub.f32 %v182_v4, %v196_v25 }
  0x4b   : > { %663 = vmatpush3.bf16.msra.mxu0 %v776_v20  ;;  %v199_v30 = vsub.f32 %v197_v28, %v198_v29  ;;  %683 = vmatpush3.bf16.msra.mxu1 %v787_v32 }
  0x4c   : > { %664 = vmatprep.subr.bf16.mxu0 %v899_v0  ;;  %684 = vmatprep.subr.bf16.mxu1 %v899_v0 }
  0x4d   : > { %v200_v33 = vmax.f32 %v199_v30, 0.0 }
  0x4f   : > { %665 = vmatpush3.bf16.msra.mxu0 %v778_v26  ;;  %v201_v34 = vadd.f32 1e-05, %v200_v33  ;;  %685 = vmatpush3.bf16.msra.mxu1 %v788_v39 }
  0x50   : > { %666 = vmatprep.subr.bf16.mxu0 %v899_v0  ;;  %686 = vmatprep.subr.bf16.mxu1 %v899_v0 }
  0x51   : > { %798 = vrsqrt.f32 %v201_v34 }
  0x53   : > { %667 = vmatpush3.bf16.msra.mxu0 %v780_v31  ;;  %687 = vmatpush3.bf16.msra.mxu1 %v789_v40 }
  0x54   : > { %692 = vmatprep.subr.bf16.mxu0 %v899_v0 }
  0x5b   : > { %v799_v36 = vpop.eup %798 }
  0x5c   : > { %v204_v37 = vmul.f32 %v799_v36, %v203_v35 }
  0x5e   : > { %v205_v38 = vpack.c.bf16 %v204_v37, %v204_v37 }
  0x60   : > { %669 = vmatmul.mubr.bf16.vlgmr.msra.gmra.mrb[0].mxu0 %v205_v38 }
  0x61   : > { %708 = vmatprep.mubr.msk.bf16.mxu0 %vm900_vm0, %v899_v0  ;;  %693 = vmatpush3.bf16.msra.mxu0 %v790_v41 }
  0x62   : > { %694 = vmatprep.subr.bf16.mxu0 %v899_v0 }
  0x65   : > { %695 = vmatpush3.bf16.msra.mxu0 %v791_v42 }
  0x66   : > { %696 = vmatprep.subr.bf16.mxu0 %v899_v0 }
  0x69   : > { %697 = vmatpush3.bf16.msra.mxu0 %v792_v43 }
  0x6a   : > { %698 = vmatprep.subr.bf16.mxu0 %v899_v0 }
  0x6d   : > { %699 = vmatpush3.bf16.msra.mxu0 %v793_v44 }
  0x6e   : > { %700 = vmatprep.subr.bf16.mxu0 %v899_v0 }
  0x71   : > { %701 = vmatpush3.bf16.msra.mxu0 %v794_v45 }
  0x72   : > { %702 = vmatprep.subr.bf16.mxu0 %v899_v0 }
  0x75   : > { %703 = vmatpush3.bf16.msra.mxu0 %v795_v46 }
  0x76   : > { %704 = vmatprep.subr.bf16.mxu0 %v899_v0 }
  0x79   : > { %705 = vmatpush3.bf16.msra.mxu0 %v796_v59 }
  0x7a   : > { %706 = vmatprep.subr.bf16.mxu0 %v899_v0 }
  0x7d   : > { %707 = vmatpush3.bf16.msra.mxu0 %v797_v60 }
 0x133   : > { %v325_v52 = vpop.f32.mrb[0].mxu0 }
 0x134   : > { %v326_v53 = vadd.f32 %v325_v52, %v242_v51  ;;  %v670_v54 = vpop.f32.mrb[1].mxu0 }
 0x135   : > { %v328_v55 = vpop.f32.mrb[2].mxu0 }
 0x136   : > { %v331_v56 = vmax.f32 %v326_v53, 0.0  ;;  %v671_v57 = vpop.f32.mrb[3].mxu0 }
 0x138   : > { %v332_v58 = vpack.c.bf16 %v331_v56, %v331_v56 }
 0x13a   : > { %689 = vmatmul.mubr.bf16.vlgmr.msra.gmra.mrb[0].mxu1 %v332_v58 }
 0x20d   : > { %v403_v63 = vpop.f32.mrb[0].mxu1 }
 0x20e   : > { %v404_v1 = vadd.f32 %v403_v63, %v336_v62  ;;  %v690_v2 = vpop.f32.mrb[1].mxu1 }
 0x20f   : > { %v406_v3 = vpop.f32.mrb[2].mxu1 }
 0x210   : > { %v409_v4 = vmax.f32 %v404_v1, 0.0  ;;  %v691_v5 = vpop.f32.mrb[3].mxu1 }
 0x212   : > { %v410_v6 = vpack.c.bf16 %v409_v4, %v409_v4 }
 0x214   : > { %709 = vmatmul.mubr.bf16.vlgmr.msra.gmra.mrb[4].mxu0 %v410_v6 }
 0x2e7   : > { %v497_v0 = vpop.f32.mrb[4].mxu0 }
 0x2e8   : > { %v498_v9 = vadd.f32 %v497_v0, %v414_v8  ;;  %v710_v10 = vpop.f32.mrb[5].mxu0 }
 0x2e9   : > { %v500_v11 = vpop.f32.mrb[6].mxu0 }
 0x2ea   : > { %503 = vst [vmem:[%s176_s5] sm:$0xff] %v498_v9  ;;  %v711_v12 = vpop.f32.mrb[7].mxu0 }
 0x2eb   : > { %841 = shalt.err (!%p838_p7)
}
 0x2ec   : > { %s842_s20 = scalar_lea.hbm %s1048_s9, 128  ;;  %s846_s26 = scalar_lea.hbm %s1093_s3, 512 }
 0x2ed   : > { %p843_p8 = scmp.ne.s32.totalorder %s1048_s9, %s842_s20  ;;  %p847_p1 = scmp.lt.u32.totalorder %s1048_s9, %s1093_s3 }
 0x2ee   : > { %p848_p0 = scmp.lt.u32.totalorder %s846_s26, %s842_s20  ;;  %p850_p6 = scmp.lt.u32.totalorder %s842_s20, %s1048_s9 }
 0x2ef   : > { %p844_p11 = pnand %p843_p8, %p1104_p9 }
 0x2f0   : > { %p849_p5 = por %p848_p0, %p847_p1 }
 0x2f1   : > { %p845_p13 = pneg %p844_p11 }
 0x2f2   : > { %p851_p10 = por %p850_p6, %p849_p5 }
 0x2f4   : > { %p852_p12 = pnand %p851_p10, %p845_p13 }
 0x2f6   : > { %855 = shalt.err (!%p852_p12)
}
 0x2f7   : > { %716 = dma.vmem_to_hbm [thread:$0]  (%p1104_p9), %s1050_s6, 128, %s1048_s9, %s505_s10  }
 0x2f8 PF: > { %p728_p2 = scmp.ge.s32.totalorder %s894_s15, 2  ;;  %s530_s29 = sand.u32 1, %s882_s12  }
 0x2f9   : > { %p1105_p3 = scmp.ne.s32.totalorder %s1098_s23, 0  ;;  %s531_s30 = scalar_lea.sflag [#allocation4], %s530_s29 }
 0x2fb   : > { %p723_p4 = pnand %p728_p2, %p1105_p3 }
 0x2fd   : > { %877 = dma.done.wait (!%p723_p4), %s531_s30, 128  }
 0x2fe   : > { %879 = vsyncadd (!%p723_p4), %s531_s30, 4294967168  ;;  %p14_p7 = scmp.ge.s32.totalorder %s947_s18, 6   ;;  %s1106_s12 = smov %s886_s13 }
 0x2ff   : > { %s1107_s13 = smov %s890_s14  ;;  %s1108_s14 = smov %s958_s21 }
 0x300   : > { %s1109_s15 = smov %s947_s18  ;;  %16 = sbr.rel (!%p14_p7) target bundleno = 4 (0x4), region = 72 }
 0x307   :  { %536 = vsyncpa [#allocation3], 1 }
 0x308   :  { %538 = vsyncpa [#allocation3 + $0x1], 1 }
 0x309   :  { %539 = vsyncpa [#allocation4], 1 }
 0x30a   :  { %541 = vsyncpa [#allocation4 + $0x1], 1 }

</bundles_post_ra>
